<compile_context>
chip_gen: v5e
topology: v5e:2x2
jax: 0.10.0
libtpu: 0.0.40
codegen_flags: <defaults>
</compile_context>

<pallas_src>
import jax
import jax.numpy as jnp
from jax.experimental import pallas as pl
from jax.experimental.pallas import tpu as pltpu


def _round_up(x, m):
    return ((x + m - 1) // m) * m


def _make_kernel(input_size):
    def net_kernel(x_ref, w1_ref, b1_ref, w2_ref, b2_ref, w3r_ref, b3_ref, o_ref):
        x = x_ref[...]            # (TB, input_size)
        w1 = w1_ref[...]          # (input_size, H)
        # fc1: K == input_size is tiny -> VPU broadcast-FMAs, keep it off the MXU.
        h = x[:, 0:1] * w1[0:1, :] + b1_ref[...]
        for k in range(1, input_size):          # static unroll (input_size is tiny)
            h = h + x[:, k:k + 1] * w1[k:k + 1, :]
        h = jnp.tanh(h)                          # l3 Tanh (EUP)
        # ln: the only MXU-worthy matmul: (TB, H) @ (H, H), H lane-aligned (512).
        h = jnp.dot(h, w2_ref[...], preferred_element_type=jnp.float32) + b2_ref[...]
        h = jnp.maximum(h, 0.0)                  # l1 ReLU (VPU)
        # fc2: N == 1 -> VPU multiply + lane reduce (MXU 1-column pass not worth it
        # unless VPU/XLU become the binding slot — keep the VPU version by default).
        out_col = jnp.sum(h * w3r_ref[...], axis=-1, keepdims=True) + b3_ref[...]  # (TB, 1)
        # Lane-dense store: one small (TB,1)->(1,TB) XLU relayout, then unmasked
        # row stores instead of TB/8 masked vst.msk column stores.
        o_ref[...] = out_col.reshape(1, -1).astype(o_ref.dtype)

    return net_kernel


def net_forward(x, w1, b1, w2, b2, w3, b3, *, block_b=None):
    """x: (B, input_size); w*: (in, out) layout; b*: (1, out). Returns (B, 1)."""
    B, input_size = x.shape
    hidden = w1.shape[1]
    out_size = w3.shape[1]
    assert out_size == 1, "kernel specialized to the Net spec (output_size=1)"
    assert w2.shape == (hidden, hidden)

    # Pad hidden dim to a lane-aligned multiple of 128 (zero padding is exact).
    H = _round_up(hidden, 128)
    ph = H - hidden
    w1p = jnp.pad(w1, ((0, 0), (0, ph)))
    b1p = jnp.pad(b1, ((0, 0), (0, ph)))
    w2p = jnp.pad(w2, ((0, ph), (0, ph)))
    b2p = jnp.pad(b2, ((0, 0), (0, ph)))
    w3r = jnp.pad(w3.T, ((0, 0), (0, ph)))      # (1, H) row for the lane reduce
    b3p = b3.reshape(1, 1)

    # Batch tiling. Default TB=512 amortizes per-grid-step overhead; the tile is
    # capped so the grid has >= 2 steps once B >= 16 (v7x megacore, neutral on
    # v5e/v6e). VMEM budget (v7x, 64 MiB/TC): resident weights ~1.3 MiB (~2.3 MiB
    # double-buffered) + TB=512 intermediates ~3 MiB — plenty of headroom.
    if block_b is None:
        block_b = 512
    if B >= 16:
        block_b = min(block_b, _round_up(pl.cdiv(B, 2), 8))
    block_b = min(block_b, _round_up(B, 8))
    TB = max(8, _round_up(block_b, 8))
    B_pad = _round_up(B, TB)
    n_blocks = B_pad // TB
    xp = jnp.pad(x, ((0, B_pad - B), (0, 0)))

    kernel = _make_kernel(input_size)
    out2d = pl.pallas_call(
        kernel,
        out_shape=jax.ShapeDtypeStruct((n_blocks, TB), jnp.float32),
        grid=(n_blocks,),
        in_specs=[
            pl.BlockSpec((TB, input_size), lambda i: (i, 0)),   # x: tiled over batch
            pl.BlockSpec((input_size, H), lambda i: (0, 0)),    # w1 (VMEM resident)
            pl.BlockSpec((1, H), lambda i: (0, 0)),             # b1
            pl.BlockSpec((H, H), lambda i: (0, 0)),             # w2 (resident, ~1 MiB)
            pl.BlockSpec((1, H), lambda i: (0, 0)),             # b2
            pl.BlockSpec((1, H), lambda i: (0, 0)),             # w3 as a (1, H) row
            pl.BlockSpec((1, 1), lambda i: (0, 0)),             # b3 scalar
        ],
        out_specs=pl.BlockSpec((1, TB), lambda i: (i, 0)),      # lane-dense output rows
        compiler_params=pltpu.CompilerParams(
            dimension_semantics=("parallel",),
        ),
    )(xp, w1p, b1p, w2p, b2p, w3r, b3p)
    # Undo the lane-dense packing: row i holds batch rows [i*TB, (i+1)*TB).
    return out2d.reshape(B_pad)[:B].reshape(B, out_size)


def init_params(key, input_size=2, hidden_size=500, output_size=1):
    """Deterministic init mimicking PyTorch Linear's U(-1/sqrt(fan_in), 1/sqrt(fan_in))."""
    ks = jax.random.split(key, 6)

    def linear(kw, kb, fan_in, fan_out):
        bound = 1.0 / jnp.sqrt(fan_in)
        w = jax.random.uniform(kw, (fan_in, fan_out), jnp.float32, -bound, bound)
        b = jax.random.uniform(kb, (1, fan_out), jnp.float32, -bound, bound)
        return w, b

    w1, b1 = linear(ks[0], ks[1], input_size, hidden_size)   # fc1
    w2, b2 = linear(ks[2], ks[3], hidden_size, hidden_size)  # ln
    w3, b3 = linear(ks[4], ks[5], hidden_size, output_size)  # fc2
    return w1, b1, w2, b2, w3, b3


if __name__ == "__main__":
    key = jax.random.PRNGKey(0)
    k_params, k_x, k_x2 = jax.random.split(key, 3)

    input_size, hidden_size, output_size = 2, 500, 1

    w1, b1, w2, b2, w3, b3 = init_params(k_params, input_size, hidden_size, output_size)

    # Pure-JAX reference (same math as the PyTorch forward; Dropout unused in eval).
    def ref_forward(xx):
        return jnp.maximum(jnp.tanh(xx @ w1 + b1) @ w2 + b2, 0.0) @ w3 + b3

    # Small-batch check (grid = 1).
    x = jax.random.normal(k_x, (8, input_size), jnp.float32)
    out = net_forward(x, w1, b1, w2, b2, w3, b3)
    jax.block_until_ready(out)
    assert out.shape == (8, output_size)
    assert jnp.allclose(out, ref_forward(x), atol=1e-4, rtol=1e-4)

    # Larger non-multiple batch: exercises batch padding, the >=2-step grid
    # (megacore sharding on v7x) and the lane-dense (1, TB) output path.
    x2 = jax.random.normal(k_x2, (300, input_size), jnp.float32)
    out2 = net_forward(x2, w1, b1, w2, b2, w3, b3)
    jax.block_until_ready(out2)
    assert out2.shape == (300, output_size)
    assert jnp.allclose(out2, ref_forward(x2), atol=1e-4, rtol=1e-4)

    print("KERNEL_OK")
</pallas_src>

<mosaic_0001>
module attributes {stable_mosaic.version = 11 : i64} {
  func.func @net_kernel(%arg0: i32, %arg1: memref<8x2xf32, #tpu.memory_space<vmem>>, %arg2: memref<2x512xf32, #tpu.memory_space<vmem>>, %arg3: memref<1x512xf32, #tpu.memory_space<vmem>>, %arg4: memref<512x512xf32, #tpu.memory_space<vmem>>, %arg5: memref<1x512xf32, #tpu.memory_space<vmem>>, %arg6: memref<1x512xf32, #tpu.memory_space<vmem>>, %arg7: memref<1x1xf32, #tpu.memory_space<vmem>>, %arg8: memref<1x8xf32, #tpu.memory_space<vmem>>) attributes {dimension_semantics = [#tpu.dimension_semantics<parallel>], iteration_bounds = array<i64: 1>, scalar_prefetch = 0 : i64, scratch_operands = 0 : i64, tpu.core_type = #tpu.core_type<tc>, window_params = [{transform_indices = @transform_0, window_bounds = array<i64: 8, 2>}, {pipeline_mode = #tpu.pipeline_mode<synchronous>, transform_indices = @transform_1, window_bounds = array<i64: 2, 512>}, {pipeline_mode = #tpu.pipeline_mode<synchronous>, transform_indices = @transform_2, window_bounds = array<i64: 1, 512>}, {pipeline_mode = #tpu.pipeline_mode<synchronous>, transform_indices = @transform_3, window_bounds = array<i64: 512, 512>}, {pipeline_mode = #tpu.pipeline_mode<synchronous>, transform_indices = @transform_4, window_bounds = array<i64: 1, 512>}, {pipeline_mode = #tpu.pipeline_mode<synchronous>, transform_indices = @transform_5, window_bounds = array<i64: 1, 512>}, {pipeline_mode = #tpu.pipeline_mode<synchronous>, transform_indices = @transform_6, window_bounds = array<i64: 1, 1>}, {transform_indices = @transform_7, window_bounds = array<i64: 1, 8>}]} {
    %c0 = arith.constant 0 : index
    %c0_0 = arith.constant 0 : index
    %0 = vector.load %arg1[%c0, %c0_0] : memref<8x2xf32, #tpu.memory_space<vmem>>, vector<8x2xf32>
    %c0_1 = arith.constant 0 : index
    %c0_2 = arith.constant 0 : index
    %1 = vector.load %arg2[%c0_1, %c0_2] : memref<2x512xf32, #tpu.memory_space<vmem>>, vector<2x512xf32>
    %2 = vector.extract_strided_slice %0 {offsets = [0, 0], sizes = [8, 1], strides = [1, 1]} : vector<8x2xf32> to vector<8x1xf32>
    %3 = vector.extract_strided_slice %1 {offsets = [0, 0], sizes = [1, 512], strides = [1, 1]} : vector<2x512xf32> to vector<1x512xf32>
    %4 = vector.broadcast %2 : vector<8x1xf32> to vector<8x512xf32>
    %5 = vector.broadcast %3 : vector<1x512xf32> to vector<8x512xf32>
    %6 = arith.mulf %4, %5 : vector<8x512xf32>
    %c0_3 = arith.constant 0 : index
    %c0_4 = arith.constant 0 : index
    %7 = vector.load %arg3[%c0_3, %c0_4] : memref<1x512xf32, #tpu.memory_space<vmem>>, vector<1x512xf32>
    %8 = vector.broadcast %7 : vector<1x512xf32> to vector<8x512xf32>
    %9 = arith.addf %6, %8 : vector<8x512xf32>
    %10 = vector.extract_strided_slice %0 {offsets = [0, 1], sizes = [8, 1], strides = [1, 1]} : vector<8x2xf32> to vector<8x1xf32>
    %11 = vector.extract_strided_slice %1 {offsets = [1, 0], sizes = [1, 512], strides = [1, 1]} : vector<2x512xf32> to vector<1x512xf32>
    %12 = vector.broadcast %10 : vector<8x1xf32> to vector<8x512xf32>
    %13 = vector.broadcast %11 : vector<1x512xf32> to vector<8x512xf32>
    %14 = arith.mulf %12, %13 : vector<8x512xf32>
    %15 = arith.addf %9, %14 : vector<8x512xf32>
    %16 = math.tanh %15 : vector<8x512xf32>
    %c0_5 = arith.constant 0 : index
    %c0_6 = arith.constant 0 : index
    %17 = vector.load %arg4[%c0_5, %c0_6] : memref<512x512xf32, #tpu.memory_space<vmem>>, vector<512x512xf32>
    %cst = arith.constant dense<0.000000e+00> : vector<8x512xf32>
    %18 = tpu.matmul %16, %17, %cst {dimension_numbers = #tpu.dot_dimension_numbers<[1], [0], [0], [1], [0, 0, 1, 1], [], []>} : vector<8x512xf32>, vector<512x512xf32>, vector<8x512xf32> -> vector<8x512xf32>
    %c0_7 = arith.constant 0 : index
    %c0_8 = arith.constant 0 : index
    %19 = vector.load %arg5[%c0_7, %c0_8] : memref<1x512xf32, #tpu.memory_space<vmem>>, vector<1x512xf32>
    %20 = vector.broadcast %19 : vector<1x512xf32> to vector<8x512xf32>
    %21 = arith.addf %18, %20 : vector<8x512xf32>
    %cst_9 = arith.constant 0.000000e+00 : f32
    %22 = vector.broadcast %cst_9 : f32 to vector<8x512xf32>
    %23 = arith.maximumf %21, %22 : vector<8x512xf32>
    %c0_10 = arith.constant 0 : index
    %c0_11 = arith.constant 0 : index
    %24 = vector.load %arg6[%c0_10, %c0_11] : memref<1x512xf32, #tpu.memory_space<vmem>>, vector<1x512xf32>
    %25 = vector.broadcast %24 : vector<1x512xf32> to vector<8x512xf32>
    %26 = arith.mulf %23, %25 : vector<8x512xf32>
    %cst_12 = arith.constant dense<0.000000e+00> : vector<8xf32>
    %27 = vector.multi_reduction <add>, %26, %cst_12 [1] : vector<8x512xf32> to vector<8xf32>
    %28 = vector.shape_cast %27 : vector<8xf32> to vector<8x1xf32>
    %c0_13 = arith.constant 0 : index
    %c0_14 = arith.constant 0 : index
    %29 = vector.load %arg7[%c0_13, %c0_14] : memref<1x1xf32, #tpu.memory_space<vmem>>, vector<1x1xf32>
    %30 = vector.broadcast %29 : vector<1x1xf32> to vector<8x1xf32>
    %31 = arith.addf %28, %30 : vector<8x1xf32>
    %32 = vector.shape_cast %31 : vector<8x1xf32> to vector<1x8xf32>
    %c0_15 = arith.constant 0 : index
    %c0_16 = arith.constant 0 : index
    %33 = vector.load %arg8[%c0_15, %c0_16] : memref<1x8xf32, #tpu.memory_space<vmem>>, vector<1x8xf32>
    tpu.vector_store %arg8[%c0_15, %c0_16], %32 {strides = array<i32>} : memref<1x8xf32, #tpu.memory_space<vmem>>, vector<1x8xf32>,
    return
  }
  func.func @transform_0(%arg0: i32) -> (i32, i32) {
    %c0_i32 = arith.constant 0 : i32
    %c0_i32_0 = arith.constant 0 : i32
    return %arg0, %c0_i32 : i32, i32
  }
  func.func @transform_1(%arg0: i32) -> (i32, i32) {
    %c0_i32 = arith.constant 0 : i32
    %c0_i32_0 = arith.constant 0 : i32
    %c0_i32_1 = arith.constant 0 : i32
    return %c0_i32, %c0_i32_0 : i32, i32
  }
  func.func @transform_2(%arg0: i32) -> (i32, i32) {
    %c0_i32 = arith.constant 0 : i32
    %c0_i32_0 = arith.constant 0 : i32
    %c0_i32_1 = arith.constant 0 : i32
    return %c0_i32, %c0_i32_0 : i32, i32
  }
  func.func @transform_3(%arg0: i32) -> (i32, i32) {
    %c0_i32 = arith.constant 0 : i32
    %c0_i32_0 = arith.constant 0 : i32
    %c0_i32_1 = arith.constant 0 : i32
    return %c0_i32, %c0_i32_0 : i32, i32
  }
  func.func @transform_4(%arg0: i32) -> (i32, i32) {
    %c0_i32 = arith.constant 0 : i32
    %c0_i32_0 = arith.constant 0 : i32
    %c0_i32_1 = arith.constant 0 : i32
    return %c0_i32, %c0_i32_0 : i32, i32
  }
  func.func @transform_5(%arg0: i32) -> (i32, i32) {
    %c0_i32 = arith.constant 0 : i32
    %c0_i32_0 = arith.constant 0 : i32
    %c0_i32_1 = arith.constant 0 : i32
    return %c0_i32, %c0_i32_0 : i32, i32
  }
  func.func @transform_6(%arg0: i32) -> (i32, i32) {
    %c0_i32 = arith.constant 0 : i32
    %c0_i32_0 = arith.constant 0 : i32
    %c0_i32_1 = arith.constant 0 : i32
    return %c0_i32, %c0_i32_0 : i32, i32
  }
  func.func @transform_7(%arg0: i32) -> (i32, i32) {
    %c0_i32 = arith.constant 0 : i32
    %c0_i32_0 = arith.constant 0 : i32
    return %arg0, %c0_i32 : i32, i32
  }
}

</mosaic_0001>

<bundles_post_ra>
// kernel: tpu_custom_call.1
= control target key start
LH: loop header
LB: loop body
LE: loop exit
PB: predicated region body
PF: predicated region fallthrough
CT: control target
= control target key end

     0   :  { %s1002_s0 = inlined_call_operand.vmem [shape: f32[8,2], index: 0, kind: input, shape index: {}]   ;;  %s1003_s1 = inlined_call_operand.vmem [shape: f32[2,512], index: 1, kind: input, shape index: {}]   ;;  %s1004_s2 = inlined_call_operand.hbm [shape: f32[1,512], index: 2, kind: input, shape index: {}]   ;;  %s1005_s3 = inlined_call_operand.hbm [shape: f32[512,512], index: 3, kind: input, shape index: {}]   ;;  %s1006_s4 = inlined_call_operand.hbm [shape: f32[1,512], index: 4, kind: input, shape index: {}]   ;;  %s1007_s5 = inlined_call_operand.vmem [shape: f32[1,512], index: 5, kind: input, shape index: {}]   ;;  %s1008_s6 = inlined_call_operand.<no memory space> [shape: f32[1,1], index: 6, kind: input, shape index: {}]   ;;  %s1009_s7 = inlined_call_operand.hbm [shape: f32[1,8], index: 7, kind: output, shape index: {}]  }
   0x1   :  { %v12_v0 = vstv %s1008_s6 }
   0x2   :  { %13 = vst [vmem:[#allocation2] sm:$0x1] %v12_v0 }
   0x3   :  { %14 = vsyncpa [#allocation4], 0 }
   0x4   :  { %15 = vsyncpa [#allocation7], 0  ;;  %s36_s28 = sshll.u32 %s1005_s3, 4  ;;  %s37_s28 = int_to_ptr.hbm [resolvable:$true] %s36_s28 }
   0x5   :  { %16 = vsyncpa [#allocation5], 0  ;;  %s903_s29 = smov [#allocation6]   ;;  %s26_s10 = sshll.u32 %s1004_s2, 4  ;;  %s27_s10 = int_to_ptr.hbm [resolvable:$true] %s26_s10 }
   0x6   :  { %s38_s30 = sshll.u32 %s903_s29, 4  ;;  %s904_s11 = smov 512   ;;  %s39_s30 = int_to_ptr.vmem [resolvable:$true] %s38_s30 }
   0x7   :  { %s905_s12 = smov 32   ;;  %s906_s6 = smov [#allocation3]  }
   0x8   :  { %44 = dma.hbm_to_vmem [thread:$0]  %s37_s28, 32768, %s39_s30, [#allocation7], %s904_s11, %s904_s11, %s905_s12  }
   0x9   :  { %s28_s13 = sshll.u32 %s906_s6, 4  ;;  %s50_s16 = sshll.u32 %s1006_s4, 4  ;;  %s29_s13 = int_to_ptr.vmem [resolvable:$true] %s28_s13  ;;  %s51_s16 = int_to_ptr.hbm [resolvable:$true] %s50_s16 }
   0xa   :  { %31 = dma.hbm_to_vmem [thread:$0]  %s27_s10, 64, %s29_s13, [#allocation4]  }
   0xb   :  { %s907_s3 = smov [#allocation8]  }
   0xc   :  { %s52_s17 = sshll.u32 %s907_s3, 4  ;;  %s53_s17 = int_to_ptr.vmem [resolvable:$true] %s52_s17 }
   0xd   :  { %55 = dma.hbm_to_vmem [thread:$0]  %s51_s16, 64, %s53_s17, [#allocation7]  }
   0xe   :  { %897 = dma.done.wait [#allocation4], 64  }
   0xf   :  { %898 = vsyncadd [#allocation4], 4294967232 }
  0x10   :  { %899 = dma.done.wait [#allocation7], 32832  }
  0x11   :  { %900 = vsyncadd [#allocation7], 4294934464  ;;  %v908_v1 = vmov 0   ;;  %v72_v2 = vld [vmem:[%s1002_s0] sm:$0xff]  ;;  %v909_v22 = vmov 1   ;;  %s769_s23 = sshll.u32 %s1009_s7, 4  ;;  %s770_s23 = int_to_ptr.hbm [resolvable:$true] %s769_s23 }
  0x12   :  { %788 = vset.pattern.permute.xlu0 %v908_v1  ;;  %790 = vset.pattern.permute.xlu1 %v908_v1  ;;  %v198_v3 = vld [vmem:[#allocation6 + $0x1e0] sm:$0xff]  ;;  %vm760_vm0 = vcmask 57344  }
  0x13   :  { %v262_v4 = vld [vmem:[#allocation6 + $0x3e0] sm:$0xff]  ;;  %76 = vperm.xlu0 %788, %v72_v2   ;;  %404 = vmatpush.msra.mxu0 %v198_v3 }
  0x14   :  { %v326_v5 = vld [vmem:[#allocation6 + $0x5e0] sm:$0xff]  ;;  %424 = vmatpush.msra.mxu1 %v262_v4 }
  0x15   :  { %v390_v6 = vld [vmem:[#allocation6 + $0x7e0] sm:$0xff]  ;;  %444 = vmatpush.msra.mxu2 %v326_v5  ;;  %v199_v5 = vld [vmem:[#allocation6 + $0x1e8] sm:$0xff] }
  0x16   :  { %v194_v7 = vld [vmem:[#allocation6 + $0x1c0] sm:$0xff]  ;;  %464 = vmatpush.msra.mxu3 %v390_v6  ;;  %v263_v6 = vld [vmem:[#allocation6 + $0x3e8] sm:$0xff] }
  0x17   :  { %v258_v8 = vld [vmem:[#allocation6 + $0x3c0] sm:$0xff]  ;;  %405 = vmatpush.msra.mxu0 %v194_v7  ;;  %v327_v7 = vld [vmem:[#allocation6 + $0x5e8] sm:$0xff] }
  0x18   :  { %v322_v9 = vld [vmem:[#allocation6 + $0x5c0] sm:$0xff]  ;;  %425 = vmatpush.msra.mxu1 %v258_v8  ;;  %v391_v8 = vld [vmem:[#allocation6 + $0x7e8] sm:$0xff] }
  0x19   :  { %v386_v10 = vld [vmem:[#allocation6 + $0x7c0] sm:$0xff]  ;;  %445 = vmatpush.msra.mxu2 %v322_v9  ;;  %v195_v9 = vld [vmem:[#allocation6 + $0x1c8] sm:$0xff] }
  0x1a   :  { %v190_v11 = vld [vmem:[#allocation6 + $0x1a0] sm:$0xff]  ;;  %465 = vmatpush.msra.mxu3 %v386_v10  ;;  %v259_v10 = vld [vmem:[#allocation6 + $0x3c8] sm:$0xff] }
  0x1b   :  { %v254_v12 = vld [vmem:[#allocation6 + $0x3a0] sm:$0xff]  ;;  %406 = vmatpush.msra.mxu0 %v190_v11  ;;  %789 = vset.pattern.permute.xlu0 %v909_v22  ;;  %v323_v11 = vld [vmem:[#allocation6 + $0x5c8] sm:$0xff] }
  0x1c   :  { %v318_v13 = vld [vmem:[#allocation6 + $0x5a0] sm:$0xff]  ;;  %426 = vmatpush.msra.mxu1 %v254_v12  ;;  %111 = vperm.xlu0 %789, %v72_v2   ;;  %v387_v12 = vld [vmem:[#allocation6 + $0x7c8] sm:$0xff] }
  0x1d   :  { %v382_v14 = vld [vmem:[#allocation6 + $0x7a0] sm:$0xff]  ;;  %446 = vmatpush.msra.mxu2 %v318_v13  ;;  %v191_v13 = vld [vmem:[#allocation6 + $0x1a8] sm:$0xff] }
  0x1e   :  { %v186_v15 = vld [vmem:[#allocation6 + $0x180] sm:$0xff]  ;;  %466 = vmatpush.msra.mxu3 %v382_v14  ;;  %v255_v14 = vld [vmem:[#allocation6 + $0x3a8] sm:$0xff] }
  0x1f   :  { %v250_v16 = vld [vmem:[#allocation6 + $0x380] sm:$0xff]  ;;  %407 = vmatpush.msra.mxu0 %v186_v15  ;;  %v319_v15 = vld [vmem:[#allocation6 + $0x5a8] sm:$0xff] }
  0x20   :  { %v314_v17 = vld [vmem:[#allocation6 + $0x580] sm:$0xff]  ;;  %427 = vmatpush.msra.mxu1 %v250_v16  ;;  %v383_v16 = vld [vmem:[#allocation6 + $0x7a8] sm:$0xff] }
  0x21   :  { %v378_v18 = vld [vmem:[#allocation6 + $0x780] sm:$0xff]  ;;  %447 = vmatpush.msra.mxu2 %v314_v17  ;;  %v187_v17 = vld [vmem:[#allocation6 + $0x188] sm:$0xff] }
  0x22   :  { %v182_v19 = vld [vmem:[#allocation6 + $0x160] sm:$0xff]  ;;  %467 = vmatpush.msra.mxu3 %v378_v18  ;;  %v251_v18 = vld [vmem:[#allocation6 + $0x388] sm:$0xff] }
  0x23   :  { %v246_v20 = vld [vmem:[#allocation6 + $0x360] sm:$0xff]  ;;  %408 = vmatpush.msra.mxu0 %v182_v19  ;;  %v315_v19 = vld [vmem:[#allocation6 + $0x588] sm:$0xff] }
  0x24   :  { %v310_v21 = vld [vmem:[#allocation6 + $0x560] sm:$0xff]  ;;  %428 = vmatpush.msra.mxu1 %v246_v20  ;;  %v379_v20 = vld [vmem:[#allocation6 + $0x788] sm:$0xff]  ;;  %791 = vset.pattern.permute.xlu0 %v908_v1 }
  0x25   :  { %v374_v23 = vld [vmem:[#allocation6 + $0x760] sm:$0xff]  ;;  %448 = vmatpush.msra.mxu2 %v310_v21  ;;  %v183_v21 = vld [vmem:[#allocation6 + $0x168] sm:$0xff] }
  0x26   :  { %v178_v24 = vld [vmem:[#allocation6 + $0x140] sm:$0xff]  ;;  %468 = vmatpush.msra.mxu3 %v374_v23  ;;  %v247_v22 = vld [vmem:[#allocation6 + $0x368] sm:$0xff] }
  0x27   :  { %v242_v25 = vld [vmem:[#allocation6 + $0x340] sm:$0xff]  ;;  %409 = vmatpush.msra.mxu0 %v178_v24  ;;  %v311_v23 = vld [vmem:[#allocation6 + $0x568] sm:$0xff] }
  0x28   :  { %v306_v26 = vld [vmem:[#allocation6 + $0x540] sm:$0xff]  ;;  %429 = vmatpush.msra.mxu1 %v242_v25  ;;  %v375_v24 = vld [vmem:[#allocation6 + $0x768] sm:$0xff] }
  0x29   :  { %v370_v27 = vld [vmem:[#allocation6 + $0x740] sm:$0xff]  ;;  %449 = vmatpush.msra.mxu2 %v306_v26  ;;  %v179_v25 = vld [vmem:[#allocation6 + $0x148] sm:$0xff] }
  0x2a   :  { %v174_v28 = vld [vmem:[#allocation6 + $0x120] sm:$0xff]  ;;  %469 = vmatpush.msra.mxu3 %v370_v27  ;;  %v243_v26 = vld [vmem:[#allocation6 + $0x348] sm:$0xff] }
  0x2b   :  { %v238_v29 = vld [vmem:[#allocation6 + $0x320] sm:$0xff]  ;;  %410 = vmatpush.msra.mxu0 %v174_v28  ;;  %v307_v27 = vld [vmem:[#allocation6 + $0x548] sm:$0xff] }
  0x2c   :  { %v302_v30 = vld [vmem:[#allocation6 + $0x520] sm:$0xff]  ;;  %430 = vmatpush.msra.mxu1 %v238_v29  ;;  %v371_v28 = vld [vmem:[#allocation6 + $0x748] sm:$0xff] }
  0x2d   :  { %v366_v31 = vld [vmem:[#allocation6 + $0x720] sm:$0xff]  ;;  %450 = vmatpush.msra.mxu2 %v302_v30  ;;  %v175_v29 = vld [vmem:[#allocation6 + $0x128] sm:$0xff] }
  0x2e   :  { %v170_v32 = vld [vmem:[#allocation6 + $0x100] sm:$0xff]  ;;  %470 = vmatpush.msra.mxu3 %v366_v31  ;;  %v239_v30 = vld [vmem:[#allocation6 + $0x328] sm:$0xff] }
  0x2f   :  { %v234_v33 = vld [vmem:[#allocation6 + $0x300] sm:$0xff]  ;;  %411 = vmatpush.msra.mxu0 %v170_v32  ;;  %v303_v31 = vld [vmem:[#allocation6 + $0x528] sm:$0xff] }
  0x30   :  { %v298_v34 = vld [vmem:[#allocation6 + $0x500] sm:$0xff]  ;;  %431 = vmatpush.msra.mxu1 %v234_v33  ;;  %v367_v32 = vld [vmem:[#allocation6 + $0x728] sm:$0xff] }
  0x31   :  { %v362_v35 = vld [vmem:[#allocation6 + $0x700] sm:$0xff]  ;;  %451 = vmatpush.msra.mxu2 %v298_v34  ;;  %v171_v33 = vld [vmem:[#allocation6 + $0x108] sm:$0xff] }
  0x32   :  { %v166_v36 = vld [vmem:[#allocation6 + $0xe0] sm:$0xff]  ;;  %471 = vmatpush.msra.mxu3 %v362_v35  ;;  %v235_v34 = vld [vmem:[#allocation6 + $0x308] sm:$0xff] }
  0x33   :  { %v230_v37 = vld [vmem:[#allocation6 + $0x2e0] sm:$0xff]  ;;  %412 = vmatpush.msra.mxu0 %v166_v36  ;;  %v299_v35 = vld [vmem:[#allocation6 + $0x508] sm:$0xff] }
  0x34   :  { %v294_v38 = vld [vmem:[#allocation6 + $0x4e0] sm:$0xff]  ;;  %432 = vmatpush.msra.mxu1 %v230_v37  ;;  %v363_v36 = vld [vmem:[#allocation6 + $0x708] sm:$0xff] }
  0x35   :  { %v358_v39 = vld [vmem:[#allocation6 + $0x6e0] sm:$0xff]  ;;  %452 = vmatpush.msra.mxu2 %v294_v38  ;;  %v167_v37 = vld [vmem:[#allocation6 + $0xe8] sm:$0xff] }
  0x36   :  { %v162_v40 = vld [vmem:[#allocation6 + $0xc0] sm:$0xff]  ;;  %472 = vmatpush.msra.mxu3 %v358_v39  ;;  %v231_v38 = vld [vmem:[#allocation6 + $0x2e8] sm:$0xff] }
  0x37   :  { %v226_v41 = vld [vmem:[#allocation6 + $0x2c0] sm:$0xff]  ;;  %413 = vmatpush.msra.mxu0 %v162_v40  ;;  %v295_v39 = vld [vmem:[#allocation6 + $0x4e8] sm:$0xff] }
  0x38   :  { %v290_v42 = vld [vmem:[#allocation6 + $0x4c0] sm:$0xff]  ;;  %433 = vmatpush.msra.mxu1 %v226_v41  ;;  %v359_v40 = vld [vmem:[#allocation6 + $0x6e8] sm:$0xff] }
  0x39   :  { %v354_v43 = vld [vmem:[#allocation6 + $0x6c0] sm:$0xff]  ;;  %453 = vmatpush.msra.mxu2 %v290_v42  ;;  %v163_v1 = vld [vmem:[#allocation6 + $0xc8] sm:$0xff] }
  0x3a   :  { %v158_v44 = vld [vmem:[#allocation6 + $0xa0] sm:$0xff]  ;;  %473 = vmatpush.msra.mxu3 %v354_v43  ;;  %v227_v41 = vld [vmem:[#allocation6 + $0x2c8] sm:$0xff] }
  0x3b   :  { %v222_v45 = vld [vmem:[#allocation6 + $0x2a0] sm:$0xff]  ;;  %414 = vmatpush.msra.mxu0 %v158_v44  ;;  %v291_v42 = vld [vmem:[#allocation6 + $0x4c8] sm:$0xff] }
  0x3c   :  { %v286_v46 = vld [vmem:[#allocation6 + $0x4a0] sm:$0xff]  ;;  %434 = vmatpush.msra.mxu1 %v222_v45  ;;  %v355_v43 = vld [vmem:[#allocation6 + $0x6c8] sm:$0xff] }
  0x3d   :  { %v350_v47 = vld [vmem:[#allocation6 + $0x6a0] sm:$0xff]  ;;  %454 = vmatpush.msra.mxu2 %v286_v46  ;;  %v159_v44 = vld [vmem:[#allocation6 + $0xa8] sm:$0xff] }
  0x3e   :  { %v154_v48 = vld [vmem:[#allocation6 + $0x80] sm:$0xff]  ;;  %474 = vmatpush.msra.mxu3 %v350_v47  ;;  %v223_v45 = vld [vmem:[#allocation6 + $0x2a8] sm:$0xff] }
  0x3f   :  { %v218_v49 = vld [vmem:[#allocation6 + $0x280] sm:$0xff]  ;;  %415 = vmatpush.msra.mxu0 %v154_v48  ;;  %v287_v46 = vld [vmem:[#allocation6 + $0x4a8] sm:$0xff] }
  0x40   :  { %v282_v50 = vld [vmem:[#allocation6 + $0x480] sm:$0xff]  ;;  %435 = vmatpush.msra.mxu1 %v218_v49  ;;  %v351_v47 = vld [vmem:[#allocation6 + $0x6a8] sm:$0xff] }
  0x41   :  { %v346_v51 = vld [vmem:[#allocation6 + $0x680] sm:$0xff]  ;;  %455 = vmatpush.msra.mxu2 %v282_v50  ;;  %v155_v48 = vld [vmem:[#allocation6 + $0x88] sm:$0xff] }
  0x42   :  { %v150_v52 = vld [vmem:[#allocation6 + $0x60] sm:$0xff]  ;;  %475 = vmatpush.msra.mxu3 %v346_v51  ;;  %v219_v49 = vld [vmem:[#allocation6 + $0x288] sm:$0xff] }
  0x43   :  { %v214_v53 = vld [vmem:[#allocation6 + $0x260] sm:$0xff]  ;;  %416 = vmatpush.msra.mxu0 %v150_v52  ;;  %v283_v50 = vld [vmem:[#allocation6 + $0x488] sm:$0xff] }
  0x44   :  { %v278_v54 = vld [vmem:[#allocation6 + $0x460] sm:$0xff]  ;;  %436 = vmatpush.msra.mxu1 %v214_v53  ;;  %v347_v51 = vld [vmem:[#allocation6 + $0x688] sm:$0xff] }
  0x45   :  { %v342_v55 = vld [vmem:[#allocation6 + $0x660] sm:$0xff]  ;;  %456 = vmatpush.msra.mxu2 %v278_v54  ;;  %v151_v52 = vld [vmem:[#allocation6 + $0x68] sm:$0xff] }
  0x46   :  { %v146_v56 = vld [vmem:[#allocation6 + $0x40] sm:$0xff]  ;;  %476 = vmatpush.msra.mxu3 %v342_v55  ;;  %v215_v53 = vld [vmem:[#allocation6 + $0x268] sm:$0xff] }
  0x47   :  { %v210_v57 = vld [vmem:[#allocation6 + $0x240] sm:$0xff]  ;;  %417 = vmatpush.msra.mxu0 %v146_v56  ;;  %v279_v54 = vld [vmem:[#allocation6 + $0x468] sm:$0xff] }
  0x48   :  { %v274_v58 = vld [vmem:[#allocation6 + $0x440] sm:$0xff]  ;;  %437 = vmatpush.msra.mxu1 %v210_v57  ;;  %v343_v55 = vld [vmem:[#allocation6 + $0x668] sm:$0xff] }
  0x49   :  { %v338_v59 = vld [vmem:[#allocation6 + $0x640] sm:$0xff]  ;;  %457 = vmatpush.msra.mxu2 %v274_v58  ;;  %v147_v56 = vld [vmem:[#allocation6 + $0x48] sm:$0xff] }
  0x4a   :  { %v142_v60 = vld [vmem:[#allocation6 + $0x20] sm:$0xff]  ;;  %477 = vmatpush.msra.mxu3 %v338_v59  ;;  %v211_v57 = vld [vmem:[#allocation6 + $0x248] sm:$0xff] }
  0x4b   :  { %v206_v61 = vld [vmem:[#allocation6 + $0x220] sm:$0xff]  ;;  %418 = vmatpush.msra.mxu0 %v142_v60  ;;  %v275_v58 = vld [vmem:[#allocation6 + $0x448] sm:$0xff] }
  0x4c   :  { %v270_v62 = vld [vmem:[#allocation6 + $0x420] sm:$0xff]  ;;  %438 = vmatpush.msra.mxu1 %v206_v61  ;;  %v339_v59 = vld [vmem:[#allocation6 + $0x648] sm:$0xff] }
  0x4d   :  { %v334_v63 = vld [vmem:[#allocation6 + $0x620] sm:$0xff]  ;;  %458 = vmatpush.msra.mxu2 %v270_v62  ;;  %v143_v60 = vld [vmem:[#allocation6 + $0x28] sm:$0xff] }
  0x4e   :  { %v138_v0 = vld [vmem:[#allocation6] sm:$0xff]  ;;  %478 = vmatpush.msra.mxu3 %v334_v63  ;;  %v207_v61 = vld [vmem:[#allocation6 + $0x228] sm:$0xff] }
  0x4f   :  { %v202_v2 = vld [vmem:[#allocation6 + $0x200] sm:$0xff]  ;;  %419 = vmatpush.msra.mxu0 %v138_v0  ;;  %v271_v62 = vld [vmem:[#allocation6 + $0x428] sm:$0xff] }
  0x50   :  { %v266_v3 = vld [vmem:[#allocation6 + $0x400] sm:$0xff]  ;;  %439 = vmatpush.msra.mxu1 %v202_v2  ;;  %v335_v63 = vld [vmem:[#allocation6 + $0x628] sm:$0xff] }
  0x51   :  { %v330_v4 = vld [vmem:[#allocation6 + $0x600] sm:$0xff]  ;;  %459 = vmatpush.msra.mxu2 %v266_v3  ;;  %484 = vmatpush.msrb.mxu0 %v199_v5  ;;  %v139_v0 = vld [vmem:[#allocation6 + $0x8] sm:$0xff] }
  0x52   :  { %479 = vmatpush.msra.mxu3 %v330_v4  ;;  %504 = vmatpush.msrb.mxu1 %v263_v6  ;;  %v203_v2 = vld [vmem:[#allocation6 + $0x208] sm:$0xff]  ;;  %v73_v5 = vld [vmem:[%s1003_s1] sm:$0xff] }
  0x53   :  { %524 = vmatpush.msrb.mxu2 %v327_v7  ;;  %485 = vmatpush.msrb.mxu0 %v195_v9  ;;  %v267_v3 = vld [vmem:[#allocation6 + $0x408] sm:$0xff]  ;;  %v80_v6 = vperm.slane %v73_v5, 0  ;;  %v81_v7 = vperm.slane %v73_v5, 2  ;;  %v83_v9 = vperm.slane %v73_v5, 6 }
  0x54   :  { %544 = vmatpush.msrb.mxu3 %v391_v8  ;;  %505 = vmatpush.msrb.mxu1 %v259_v10  ;;  %v331_v4 = vld [vmem:[#allocation6 + $0x608] sm:$0xff]  ;;  %v82_v8 = vperm.slane %v73_v5, 4 }
  0x55   :  { %525 = vmatpush.msrb.mxu2 %v323_v11  ;;  %486 = vmatpush.msrb.mxu0 %v191_v13  ;;  %v88_v11 = vperm.slane %v80_v6, 0  ;;  %v244_v6 = vld [vmem:[#allocation6 + $0x350] sm:$0xff] }
  0x56   :  { %545 = vmatpush.msrb.mxu3 %v387_v12  ;;  %506 = vmatpush.msrb.mxu1 %v255_v14  ;;  %v89_v12 = vperm.slane %v81_v7, 0  ;;  %v90_v13 = vperm.slane %v82_v8, 0  ;;  %v96_v14 = vld [vmem:[#allocation3] sm:$0xf]  ;;  %v308_v7 = vld [vmem:[#allocation6 + $0x550] sm:$0xff] }
  0x57   :  { %526 = vmatpush.msrb.mxu2 %v319_v15  ;;  %487 = vmatpush.msrb.mxu0 %v187_v17  ;;  %v114_v15 = vperm.slane %v73_v5, 1  ;;  %v116_v17 = vperm.slane %v73_v5, 5  ;;  %v372_v8 = vld [vmem:[#allocation6 + $0x750] sm:$0xff] }
  0x58   :  { %546 = vmatpush.msrb.mxu3 %v383_v16  ;;  %507 = vmatpush.msrb.mxu1 %v251_v18  ;;  %v115_v16 = vperm.slane %v73_v5, 3  ;;  %v117_v18 = vperm.slane %v73_v5, 7  ;;  %v180_v5 = vld [vmem:[#allocation6 + $0x150] sm:$0xff] }
  0x59   :  { %527 = vmatpush.msrb.mxu2 %v315_v19  ;;  %488 = vmatpush.msrb.mxu0 %v183_v21  ;;  %v91_v19 = vperm.slane %v83_v9, 0  ;;  %v99_v21 = vperm.slane %v96_v14, 1  ;;  %v176_v9 = vld [vmem:[#allocation6 + $0x130] sm:$0xff] }
  0x5a   :  { %547 = vmatpush.msrb.mxu3 %v379_v20  ;;  %508 = vmatpush.msrb.mxu1 %v247_v22  ;;  %v98_v20 = vperm.slane %v96_v14, 0 }
  0x5b   :  { %528 = vmatpush.msrb.mxu2 %v311_v23  ;;  %489 = vmatpush.msrb.mxu0 %v179_v25  ;;  %v100_v25 = vperm.slane %v96_v14, 2 }
  0x5c   :  { %548 = vmatpush.msrb.mxu3 %v375_v24  ;;  %509 = vmatpush.msrb.mxu1 %v243_v26  ;;  %v122_v26 = vperm.slane %v114_v15, 1  ;;  %v300_v15 = vld [vmem:[#allocation6 + $0x510] sm:$0xff] }
  0x5d   :  { %529 = vmatpush.msrb.mxu2 %v307_v27  ;;  %490 = vmatpush.msrb.mxu0 %v175_v29  ;;  %v123_v27 = vperm.slane %v115_v16, 1  ;;  %v125_v29 = vperm.slane %v117_v18, 1  ;;  %v364_v16 = vld [vmem:[#allocation6 + $0x710] sm:$0xff] }
  0x5e   :  { %549 = vmatpush.msrb.mxu3 %v371_v28  ;;  %510 = vmatpush.msrb.mxu1 %v239_v30  ;;  %v124_v28 = vperm.slane %v116_v17, 1  ;;  %v168_v17 = vld [vmem:[#allocation6 + $0xf0] sm:$0xff] }
  0x5f   :  { %530 = vmatpush.msrb.mxu2 %v303_v31  ;;  %491 = vmatpush.msrb.mxu0 %v171_v33  ;;  %v101_v31 = vperm.slane %v96_v14, 3  ;;  %v236_v14 = vld [vmem:[#allocation6 + $0x310] sm:$0xff] }
  0x60   :  { %550 = vmatpush.msrb.mxu3 %v367_v32  ;;  %511 = vmatpush.msrb.mxu1 %v235_v34  ;;  %v232_v18 = vld [vmem:[#allocation6 + $0x2f0] sm:$0xff] }
  0x61   :  { %531 = vmatpush.msrb.mxu2 %v299_v35  ;;  %492 = vmatpush.msrb.mxu0 %v167_v37 }
  0x62   :  { %551 = vmatpush.msrb.mxu3 %v363_v36  ;;  %512 = vmatpush.msrb.mxu1 %v231_v38 }
  0x63   :  { %532 = vmatpush.msrb.mxu2 %v295_v39  ;;  %493 = vmatpush.msrb.mxu0 %v163_v1 }
  0x64   :  { %552 = vmatpush.msrb.mxu3 %v359_v40  ;;  %513 = vmatpush.msrb.mxu1 %v227_v41 }
  0x65   :  { %533 = vmatpush.msrb.mxu2 %v291_v42  ;;  %494 = vmatpush.msrb.mxu0 %v159_v44  ;;  %v200_v44 = vld [vmem:[#allocation6 + $0x1f0] sm:$0xff] }
  0x66   :  { %553 = vmatpush.msrb.mxu3 %v355_v43  ;;  %514 = vmatpush.msrb.mxu1 %v223_v45 }
  0x67   :  { %534 = vmatpush.msrb.mxu2 %v287_v46  ;;  %495 = vmatpush.msrb.mxu0 %v155_v48  ;;  %v264_v46 = vld [vmem:[#allocation6 + $0x3f0] sm:$0xff] }
  0x68   :  { %554 = vmatpush.msrb.mxu3 %v351_v47  ;;  %515 = vmatpush.msrb.mxu1 %v219_v49  ;;  %v328_v48 = vld [vmem:[#allocation6 + $0x5f0] sm:$0xff] }
  0x69   :  { %535 = vmatpush.msrb.mxu2 %v283_v50  ;;  %496 = vmatpush.msrb.mxu0 %v151_v52  ;;  %v392_v50 = vld [vmem:[#allocation6 + $0x7f0] sm:$0xff] }
  0x6a   :  { %555 = vmatpush.msrb.mxu3 %v347_v51  ;;  %516 = vmatpush.msrb.mxu1 %v215_v53  ;;  %v196_v51 = vld [vmem:[#allocation6 + $0x1d0] sm:$0xff] }
  0x6b   :  { %536 = vmatpush.msrb.mxu2 %v279_v54  ;;  %497 = vmatpush.msrb.mxu0 %v147_v56  ;;  %v260_v53 = vld [vmem:[#allocation6 + $0x3d0] sm:$0xff] }
  0x6c   :  { %556 = vmatpush.msrb.mxu3 %v343_v55  ;;  %517 = vmatpush.msrb.mxu1 %v211_v57  ;;  %v324_v54 = vld [vmem:[#allocation6 + $0x5d0] sm:$0xff] }
  0x6d   :  { %537 = vmatpush.msrb.mxu2 %v275_v58  ;;  %498 = vmatpush.msrb.mxu0 %v143_v60  ;;  %v388_v55 = vld [vmem:[#allocation6 + $0x7d0] sm:$0xff] }
  0x6e   :  { %557 = vmatpush.msrb.mxu3 %v339_v59  ;;  %518 = vmatpush.msrb.mxu1 %v207_v61  ;;  %v192_v56 = vld [vmem:[#allocation6 + $0x1b0] sm:$0xff] }
  0x6f   :  { %538 = vmatpush.msrb.mxu2 %v271_v62  ;;  %499 = vmatpush.msrb.mxu0 %v139_v0  ;;  %v256_v57 = vld [vmem:[#allocation6 + $0x3b0] sm:$0xff] }
  0x70   :  { %558 = vmatpush.msrb.mxu3 %v335_v63  ;;  %519 = vmatpush.msrb.mxu1 %v203_v2  ;;  %v320_v58 = vld [vmem:[#allocation6 + $0x5b0] sm:$0xff] }
  0x71   :  { %539 = vmatpush.msrb.mxu2 %v267_v3  ;;  %v384_v59 = vld [vmem:[#allocation6 + $0x7b0] sm:$0xff] }
  0x72   :  { %559 = vmatpush.msrb.mxu3 %v331_v4  ;;  %v188_v60 = vld [vmem:[#allocation6 + $0x190] sm:$0xff] }
  0x73   :  { %v252_v61 = vld [vmem:[#allocation6 + $0x390] sm:$0xff] }
  0x74   :  { %v316_v62 = vld [vmem:[#allocation6 + $0x590] sm:$0xff] }
  0x75   :  { %v380_v63 = vld [vmem:[#allocation6 + $0x790] sm:$0xff] }
  0x76   :  { %v184_v0 = vld [vmem:[#allocation6 + $0x170] sm:$0xff] }
  0x77   :  { %v248_v2 = vld [vmem:[#allocation6 + $0x370] sm:$0xff] }
  0x78   :  { %v312_v3 = vld [vmem:[#allocation6 + $0x570] sm:$0xff] }
  0x79   :  { %v376_v4 = vld [vmem:[#allocation6 + $0x770] sm:$0xff] }
  0x85   :  { %v77_v10 = vpop.permute.xlu0 %76 }
  0x86   :  { %v92_v22 = vmul.f32 %v88_v11, %v77_v10  ;;  %v93_v23 = vmul.f32 %v89_v12, %v77_v10  ;;  %v94_v24 = vmul.f32 %v90_v13, %v77_v10  ;;  %v95_v30 = vmul.f32 %v91_v19, %v77_v10  ;;  %v240_v10 = vld [vmem:[#allocation6 + $0x330] sm:$0xff] }
  0x87   :  { %v304_v11 = vld [vmem:[#allocation6 + $0x530] sm:$0xff] }
  0x88   :  { %v106_v32 = vadd.f32 %v98_v20, %v92_v22  ;;  %v107_v33 = vadd.f32 %v99_v21, %v93_v23  ;;  %v108_v34 = vadd.f32 %v100_v25, %v94_v24  ;;  %v109_v40 = vadd.f32 %v101_v31, %v95_v30  ;;  %v368_v12 = vld [vmem:[#allocation6 + $0x730] sm:$0xff] }
  0x89   :  { %v172_v13 = vld [vmem:[#allocation6 + $0x110] sm:$0xff] }
  0x8a   :  { %v296_v19 = vld [vmem:[#allocation6 + $0x4f0] sm:$0xff] }
  0x8b   :  { %v360_v20 = vld [vmem:[#allocation6 + $0x6f0] sm:$0xff] }
  0x8c   :  { %v164_v21 = vld [vmem:[#allocation6 + $0xd0] sm:$0xff] }
  0x8d   :  { %v228_v22 = vld [vmem:[#allocation6 + $0x2d0] sm:$0xff] }
  0x8e   :  { %v112_v35 = vpop.permute.xlu0 %111  ;;  %v292_v23 = vld [vmem:[#allocation6 + $0x4d0] sm:$0xff] }
  0x8f   :  { %v126_v36 = vmul.f32 %v122_v26, %v112_v35  ;;  %v127_v37 = vmul.f32 %v123_v27, %v112_v35  ;;  %v128_v38 = vmul.f32 %v124_v28, %v112_v35  ;;  %v129_v39 = vmul.f32 %v125_v29, %v112_v35  ;;  %v356_v24 = vld [vmem:[#allocation6 + $0x6d0] sm:$0xff] }
  0x90   :  { %v160_v25 = vld [vmem:[#allocation6 + $0xb0] sm:$0xff] }
  0x91   :  { %v130_v1 = vadd.f32 %v126_v36, %v106_v32  ;;  %v131_v41 = vadd.f32 %v127_v37, %v107_v33  ;;  %v132_v42 = vadd.f32 %v128_v38, %v108_v34  ;;  %v133_v43 = vadd.f32 %v129_v39, %v109_v40  ;;  %v224_v26 = vld [vmem:[#allocation6 + $0x2b0] sm:$0xff] }
  0x92   :  { %v288_v27 = vld [vmem:[#allocation6 + $0x4b0] sm:$0xff] }
  0x93   :  { %793 = vtanh.f32 %v130_v1  ;;  %v352_v28 = vld [vmem:[#allocation6 + $0x6b0] sm:$0xff] }
  0x94   :  { %795 = vtanh.f32 %v131_v41  ;;  %v156_v29 = vld [vmem:[#allocation6 + $0x90] sm:$0xff] }
  0x95   :  { %797 = vtanh.f32 %v132_v42  ;;  %v220_v30 = vld [vmem:[#allocation6 + $0x290] sm:$0xff] }
  0x96   :  { %799 = vtanh.f32 %v133_v43  ;;  %v284_v31 = vld [vmem:[#allocation6 + $0x490] sm:$0xff] }
  0x97   :  { %v348_v32 = vld [vmem:[#allocation6 + $0x690] sm:$0xff] }
  0x98   :  { %v152_v33 = vld [vmem:[#allocation6 + $0x70] sm:$0xff] }
  0x99   :  { %v972_v45 = vpop.eup %793  ;;  %v216_v34 = vld [vmem:[#allocation6 + $0x270] sm:$0xff] }
  0x9a   :  { %v974_v47 = vpop.eup %795  ;;  %420 = vmatmul.f32.vlgmr.msra.gmra.mxu0 %v972_v45  ;;  %v280_v35 = vld [vmem:[#allocation6 + $0x470] sm:$0xff] }
  0x9b   :  { %v977_v49 = vpop.eup %797  ;;  %440 = vmatmul.f32.vlgmr.msra.gmra.mxu1 %v974_v47  ;;  %564 = vmatpush.msra.mxu0 %v200_v44  ;;  %v344_v36 = vld [vmem:[#allocation6 + $0x670] sm:$0xff] }
  0x9c   :  { %v980_v52 = vpop.eup %799  ;;  %460 = vmatmul.f32.vlgmr.msra.gmra.mxu2 %v977_v49  ;;  %584 = vmatpush.msra.mxu1 %v264_v46  ;;  %v148_v37 = vld [vmem:[#allocation6 + $0x50] sm:$0xff] }
  0x9d   :  { %480 = vmatmul.f32.vlgmr.msra.gmra.mxu3 %v980_v52  ;;  %604 = vmatpush.msra.mxu2 %v328_v48  ;;  %v212_v38 = vld [vmem:[#allocation6 + $0x250] sm:$0xff] }
  0x9e   :  { %624 = vmatpush.msra.mxu3 %v392_v50  ;;  %565 = vmatpush.msra.mxu0 %v196_v51  ;;  %v276_v39 = vld [vmem:[#allocation6 + $0x450] sm:$0xff]  ;;  %v201_v51 = vld [vmem:[#allocation6 + $0x1f8] sm:$0xff] }
  0x9f   :  { %585 = vmatpush.msra.mxu1 %v260_v53  ;;  %605 = vmatpush.msra.mxu2 %v324_v54  ;;  %v340_v40 = vld [vmem:[#allocation6 + $0x650] sm:$0xff]  ;;  %v265_v53 = vld [vmem:[#allocation6 + $0x3f8] sm:$0xff] }
  0xa0   :  { %625 = vmatpush.msra.mxu3 %v388_v55  ;;  %566 = vmatpush.msra.mxu0 %v192_v56  ;;  %v144_v1 = vld [vmem:[#allocation6 + $0x30] sm:$0xff]  ;;  %v329_v54 = vld [vmem:[#allocation6 + $0x5f8] sm:$0xff] }
  0xa1   :  { %586 = vmatpush.msra.mxu1 %v256_v57  ;;  %606 = vmatpush.msra.mxu2 %v320_v58  ;;  %v208_v41 = vld [vmem:[#allocation6 + $0x230] sm:$0xff]  ;;  %v393_v55 = vld [vmem:[#allocation6 + $0x7f8] sm:$0xff] }
  0xa2   :  { %626 = vmatpush.msra.mxu3 %v384_v59  ;;  %567 = vmatpush.msra.mxu0 %v188_v60  ;;  %v272_v42 = vld [vmem:[#allocation6 + $0x430] sm:$0xff]  ;;  %v197_v56 = vld [vmem:[#allocation6 + $0x1d8] sm:$0xff] }
  0xa3   :  { %587 = vmatpush.msra.mxu1 %v252_v61  ;;  %607 = vmatpush.msra.mxu2 %v316_v62  ;;  %v336_v43 = vld [vmem:[#allocation6 + $0x630] sm:$0xff]  ;;  %v261_v57 = vld [vmem:[#allocation6 + $0x3d8] sm:$0xff] }
  0xa4   :  { %627 = vmatpush.msra.mxu3 %v380_v63  ;;  %500 = vmatmul.f32.vlgmr.msrb.gmra.mxu0 %v972_v45  ;;  %v140_v44 = vld [vmem:[#allocation6 + $0x10] sm:$0xff]  ;;  %v325_v58 = vld [vmem:[#allocation6 + $0x5d8] sm:$0xff] }
  0xa5   :  { %520 = vmatmul.f32.vlgmr.msrb.gmra.mxu1 %v974_v47  ;;  %540 = vmatmul.f32.vlgmr.msrb.gmra.mxu2 %v977_v49  ;;  %v204_v46 = vld [vmem:[#allocation6 + $0x210] sm:$0xff]  ;;  %v389_v59 = vld [vmem:[#allocation6 + $0x7d8] sm:$0xff] }
  0xa6   :  { %560 = vmatmul.f32.vlgmr.msrb.gmra.mxu3 %v980_v52  ;;  %568 = vmatpush.msra.mxu0 %v184_v0  ;;  %v268_v48 = vld [vmem:[#allocation6 + $0x410] sm:$0xff]  ;;  %v193_v60 = vld [vmem:[#allocation6 + $0x1b8] sm:$0xff] }
  0xa7   :  { %588 = vmatpush.msra.mxu1 %v248_v2  ;;  %608 = vmatpush.msra.mxu2 %v312_v3  ;;  %v332_v50 = vld [vmem:[#allocation6 + $0x610] sm:$0xff]  ;;  %v257_v61 = vld [vmem:[#allocation6 + $0x3b8] sm:$0xff] }
  0xa8   :  { %628 = vmatpush.msra.mxu3 %v376_v4  ;;  %569 = vmatpush.msra.mxu0 %v180_v5  ;;  %v321_v62 = vld [vmem:[#allocation6 + $0x5b8] sm:$0xff] }
  0xa9   :  { %589 = vmatpush.msra.mxu1 %v244_v6  ;;  %609 = vmatpush.msra.mxu2 %v308_v7  ;;  %v385_v63 = vld [vmem:[#allocation6 + $0x7b8] sm:$0xff] }
  0xaa   :  { %629 = vmatpush.msra.mxu3 %v372_v8  ;;  %570 = vmatpush.msra.mxu0 %v176_v9  ;;  %v189_v0 = vld [vmem:[#allocation6 + $0x198] sm:$0xff] }
  0xab   :  { %590 = vmatpush.msra.mxu1 %v240_v10  ;;  %610 = vmatpush.msra.mxu2 %v304_v11  ;;  %v253_v2 = vld [vmem:[#allocation6 + $0x398] sm:$0xff] }
  0xac   :  { %630 = vmatpush.msra.mxu3 %v368_v12  ;;  %571 = vmatpush.msra.mxu0 %v172_v13  ;;  %v317_v3 = vld [vmem:[#allocation6 + $0x598] sm:$0xff] }
  0xad   :  { %591 = vmatpush.msra.mxu1 %v236_v14  ;;  %611 = vmatpush.msra.mxu2 %v300_v15  ;;  %v381_v4 = vld [vmem:[#allocation6 + $0x798] sm:$0xff] }
  0xae   :  { %631 = vmatpush.msra.mxu3 %v364_v16  ;;  %572 = vmatpush.msra.mxu0 %v168_v17  ;;  %v185_v5 = vld [vmem:[#allocation6 + $0x178] sm:$0xff] }
  0xaf   :  { %592 = vmatpush.msra.mxu1 %v232_v18  ;;  %612 = vmatpush.msra.mxu2 %v296_v19  ;;  %v249_v6 = vld [vmem:[#allocation6 + $0x378] sm:$0xff] }
  0xb0   :  { %632 = vmatpush.msra.mxu3 %v360_v20  ;;  %573 = vmatpush.msra.mxu0 %v164_v21  ;;  %v313_v7 = vld [vmem:[#allocation6 + $0x578] sm:$0xff] }
  0xb1   :  { %593 = vmatpush.msra.mxu1 %v228_v22  ;;  %613 = vmatpush.msra.mxu2 %v292_v23  ;;  %v377_v8 = vld [vmem:[#allocation6 + $0x778] sm:$0xff] }
  0xb2   :  { %633 = vmatpush.msra.mxu3 %v356_v24  ;;  %574 = vmatpush.msra.mxu0 %v160_v25  ;;  %v181_v9 = vld [vmem:[#allocation6 + $0x158] sm:$0xff] }
  0xb3   :  { %594 = vmatpush.msra.mxu1 %v224_v26  ;;  %614 = vmatpush.msra.mxu2 %v288_v27  ;;  %v245_v10 = vld [vmem:[#allocation6 + $0x358] sm:$0xff] }
  0xb4   :  { %634 = vmatpush.msra.mxu3 %v352_v28  ;;  %575 = vmatpush.msra.mxu0 %v156_v29  ;;  %v309_v11 = vld [vmem:[#allocation6 + $0x558] sm:$0xff] }
  0xb5   :  { %595 = vmatpush.msra.mxu1 %v220_v30  ;;  %615 = vmatpush.msra.mxu2 %v284_v31  ;;  %v373_v12 = vld [vmem:[#allocation6 + $0x758] sm:$0xff] }
  0xb6   :  { %635 = vmatpush.msra.mxu3 %v348_v32  ;;  %576 = vmatpush.msra.mxu0 %v152_v33  ;;  %v177_v13 = vld [vmem:[#allocation6 + $0x138] sm:$0xff] }
  0xb7   :  { %596 = vmatpush.msra.mxu1 %v216_v34  ;;  %616 = vmatpush.msra.mxu2 %v280_v35  ;;  %v241_v14 = vld [vmem:[#allocation6 + $0x338] sm:$0xff] }
  0xb8   :  { %636 = vmatpush.msra.mxu3 %v344_v36  ;;  %577 = vmatpush.msra.mxu0 %v148_v37  ;;  %v305_v15 = vld [vmem:[#allocation6 + $0x538] sm:$0xff] }
  0xb9   :  { %597 = vmatpush.msra.mxu1 %v212_v38  ;;  %617 = vmatpush.msra.mxu2 %v276_v39  ;;  %v369_v16 = vld [vmem:[#allocation6 + $0x738] sm:$0xff] }
  0xba   :  { %637 = vmatpush.msra.mxu3 %v340_v40  ;;  %578 = vmatpush.msra.mxu0 %v144_v1  ;;  %v173_v17 = vld [vmem:[#allocation6 + $0x118] sm:$0xff] }
  0xbb   :  { %598 = vmatpush.msra.mxu1 %v208_v41  ;;  %618 = vmatpush.msra.mxu2 %v272_v42  ;;  %v237_v18 = vld [vmem:[#allocation6 + $0x318] sm:$0xff] }
  0xbc   :  { %638 = vmatpush.msra.mxu3 %v336_v43  ;;  %579 = vmatpush.msra.mxu0 %v140_v44  ;;  %v301_v19 = vld [vmem:[#allocation6 + $0x518] sm:$0xff] }
  0xbd   :  { %599 = vmatpush.msra.mxu1 %v204_v46  ;;  %619 = vmatpush.msra.mxu2 %v268_v48  ;;  %v365_v20 = vld [vmem:[#allocation6 + $0x718] sm:$0xff] }
  0xbe   :  { %639 = vmatpush.msra.mxu3 %v332_v50  ;;  %580 = vmatmul.f32.vlgmr.msra.gmra.mxu0 %v972_v45  ;;  %v169_v21 = vld [vmem:[#allocation6 + $0xf8] sm:$0xff] }
  0xbf   :  { %600 = vmatmul.f32.vlgmr.msra.gmra.mxu1 %v974_v47  ;;  %620 = vmatmul.f32.vlgmr.msra.gmra.mxu2 %v977_v49  ;;  %v233_v22 = vld [vmem:[#allocation6 + $0x2f8] sm:$0xff] }
  0xc0   :  { %640 = vmatmul.f32.vlgmr.msra.gmra.mxu3 %v980_v52  ;;  %644 = vmatpush.msrb.mxu0 %v201_v51  ;;  %v297_v23 = vld [vmem:[#allocation6 + $0x4f8] sm:$0xff] }
  0xc1   :  { %664 = vmatpush.msrb.mxu1 %v265_v53  ;;  %684 = vmatpush.msrb.mxu2 %v329_v54  ;;  %v361_v24 = vld [vmem:[#allocation6 + $0x6f8] sm:$0xff] }
  0xc2   :  { %704 = vmatpush.msrb.mxu3 %v393_v55  ;;  %645 = vmatpush.msrb.mxu0 %v197_v56  ;;  %v165_v25 = vld [vmem:[#allocation6 + $0xd8] sm:$0xff] }
  0xc3   :  { %665 = vmatpush.msrb.mxu1 %v261_v57  ;;  %685 = vmatpush.msrb.mxu2 %v325_v58  ;;  %v229_v26 = vld [vmem:[#allocation6 + $0x2d8] sm:$0xff] }
  0xc4   :  { %705 = vmatpush.msrb.mxu3 %v389_v59  ;;  %646 = vmatpush.msrb.mxu0 %v193_v60  ;;  %v293_v27 = vld [vmem:[#allocation6 + $0x4d8] sm:$0xff] }
  0xc5   :  { %666 = vmatpush.msrb.mxu1 %v257_v61  ;;  %686 = vmatpush.msrb.mxu2 %v321_v62  ;;  %v357_v28 = vld [vmem:[#allocation6 + $0x6d8] sm:$0xff]  ;;  %v394_v61 = vld [vmem:[#allocation8] sm:$0xf] }
  0xc6   :  { %706 = vmatpush.msrb.mxu3 %v385_v63  ;;  %647 = vmatpush.msrb.mxu0 %v189_v0  ;;  %v161_v29 = vld [vmem:[#allocation6 + $0xb8] sm:$0xff]  ;;  %v397_v62 = vperm.slane %v394_v61, 1 }
  0xc7   :  { %667 = vmatpush.msrb.mxu1 %v253_v2  ;;  %687 = vmatpush.msrb.mxu2 %v317_v3  ;;  %v225_v30 = vld [vmem:[#allocation6 + $0x2b8] sm:$0xff]  ;;  %v396_v2 = vperm.slane %v394_v61, 0  ;;  %v398_v3 = vperm.slane %v394_v61, 2 }
  0xc8   :  { %707 = vmatpush.msrb.mxu3 %v381_v4  ;;  %648 = vmatpush.msrb.mxu0 %v185_v5  ;;  %v289_v31 = vld [vmem:[#allocation6 + $0x4b8] sm:$0xff] }
  0xc9   :  { %668 = vmatpush.msrb.mxu1 %v249_v6  ;;  %688 = vmatpush.msrb.mxu2 %v313_v7  ;;  %v353_v32 = vld [vmem:[#allocation6 + $0x6b8] sm:$0xff] }
  0xca   :  { %708 = vmatpush.msrb.mxu3 %v377_v8  ;;  %649 = vmatpush.msrb.mxu0 %v181_v9  ;;  %v157_v33 = vld [vmem:[#allocation6 + $0x98] sm:$0xff] }
  0xcb   :  { %669 = vmatpush.msrb.mxu1 %v245_v10  ;;  %689 = vmatpush.msrb.mxu2 %v309_v11  ;;  %v221_v34 = vld [vmem:[#allocation6 + $0x298] sm:$0xff] }
  0xcc   :  { %709 = vmatpush.msrb.mxu3 %v373_v12  ;;  %650 = vmatpush.msrb.mxu0 %v177_v13  ;;  %v285_v35 = vld [vmem:[#allocation6 + $0x498] sm:$0xff]  ;;  %v399_v13 = vperm.slane %v394_v61, 3 }
  0xcd   :  { %670 = vmatpush.msrb.mxu1 %v241_v14  ;;  %690 = vmatpush.msrb.mxu2 %v305_v15  ;;  %v349_v36 = vld [vmem:[#allocation6 + $0x698] sm:$0xff] }
  0xce   :  { %710 = vmatpush.msrb.mxu3 %v369_v16  ;;  %651 = vmatpush.msrb.mxu0 %v173_v17  ;;  %v153_v37 = vld [vmem:[#allocation6 + $0x78] sm:$0xff] }
  0xcf   :  { %671 = vmatpush.msrb.mxu1 %v237_v18  ;;  %691 = vmatpush.msrb.mxu2 %v301_v19  ;;  %v217_v38 = vld [vmem:[#allocation6 + $0x278] sm:$0xff] }
  0xd0   :  { %711 = vmatpush.msrb.mxu3 %v365_v20  ;;  %652 = vmatpush.msrb.mxu0 %v169_v21  ;;  %v281_v39 = vld [vmem:[#allocation6 + $0x478] sm:$0xff] }
  0xd1   :  { %672 = vmatpush.msrb.mxu1 %v233_v22  ;;  %692 = vmatpush.msrb.mxu2 %v297_v23  ;;  %v345_v40 = vld [vmem:[#allocation6 + $0x678] sm:$0xff] }
  0xd2   :  { %712 = vmatpush.msrb.mxu3 %v361_v24  ;;  %653 = vmatpush.msrb.mxu0 %v165_v25  ;;  %v149_v1 = vld [vmem:[#allocation6 + $0x58] sm:$0xff] }
  0xd3   :  { %673 = vmatpush.msrb.mxu1 %v229_v26  ;;  %693 = vmatpush.msrb.mxu2 %v293_v27  ;;  %v213_v41 = vld [vmem:[#allocation6 + $0x258] sm:$0xff] }
  0xd4   :  { %713 = vmatpush.msrb.mxu3 %v357_v28  ;;  %654 = vmatpush.msrb.mxu0 %v161_v29  ;;  %v277_v42 = vld [vmem:[#allocation6 + $0x458] sm:$0xff] }
  0xd5   :  { %674 = vmatpush.msrb.mxu1 %v225_v30  ;;  %694 = vmatpush.msrb.mxu2 %v289_v31  ;;  %v341_v43 = vld [vmem:[#allocation6 + $0x658] sm:$0xff] }
  0xd6   :  { %714 = vmatpush.msrb.mxu3 %v353_v32  ;;  %655 = vmatpush.msrb.mxu0 %v157_v33  ;;  %v145_v44 = vld [vmem:[#allocation6 + $0x38] sm:$0xff] }
  0xd7   :  { %675 = vmatpush.msrb.mxu1 %v221_v34  ;;  %695 = vmatpush.msrb.mxu2 %v285_v35  ;;  %v209_v46 = vld [vmem:[#allocation6 + $0x238] sm:$0xff] }
  0xd8   :  { %715 = vmatpush.msrb.mxu3 %v349_v36  ;;  %656 = vmatpush.msrb.mxu0 %v153_v37  ;;  %v273_v48 = vld [vmem:[#allocation6 + $0x438] sm:$0xff] }
  0xd9   :  { %676 = vmatpush.msrb.mxu1 %v217_v38  ;;  %696 = vmatpush.msrb.mxu2 %v281_v39  ;;  %v337_v50 = vld [vmem:[#allocation6 + $0x638] sm:$0xff] }
  0xda   :  { %716 = vmatpush.msrb.mxu3 %v345_v40  ;;  %657 = vmatpush.msrb.mxu0 %v149_v1  ;;  %v141_v51 = vld [vmem:[#allocation6 + $0x18] sm:$0xff] }
  0xdb   :  { %677 = vmatpush.msrb.mxu1 %v213_v41  ;;  %697 = vmatpush.msrb.mxu2 %v277_v42  ;;  %v205_v53 = vld [vmem:[#allocation6 + $0x218] sm:$0xff] }
  0xdc   :  { %717 = vmatpush.msrb.mxu3 %v341_v43  ;;  %658 = vmatpush.msrb.mxu0 %v145_v44  ;;  %v269_v54 = vld [vmem:[#allocation6 + $0x418] sm:$0xff]  ;;  %v756_v44 = vlaneseq }
  0xdd   :  { %678 = vmatpush.msrb.mxu1 %v209_v46  ;;  %698 = vmatpush.msrb.mxu2 %v273_v48  ;;  %v333_v55 = vld [vmem:[#allocation6 + $0x618] sm:$0xff] }
  0xde   :  { %718 = vmatpush.msrb.mxu3 %v337_v50  ;;  %659 = vmatpush.msrb.mxu0 %v141_v51  ;;  %v728_v18 = vld [vmem:[%s1007_s5] sm:$0xf]  ;;  %v757_v46 = vand.u32 127, %v756_v44  ;;  %s910_s5 = smov [#allocation9]  }
  0xdf   :  { %679 = vmatpush.msrb.mxu1 %v205_v53  ;;  %699 = vmatpush.msrb.mxu2 %v269_v54  ;;  %v731_v22 = vperm.slane %v728_v18, 1  ;;  %v730_v23 = vperm.slane %v728_v18, 0  ;;  %v732_v27 = vperm.slane %v728_v18, 2  ;;  %v733_v36 = vperm.slane %v728_v18, 3  ;;  %v792_v41 = vld [vmem:[#allocation2] ss:$0 sm:$0xff] }
  0xe0   :  { %719 = vmatpush.msrb.mxu3 %v333_v55  ;;  %660 = vmatmul.f32.vlgmr.msrb.gmra.mxu0 %v972_v45  ;;  %s767_s20 = sshll.u32 %s910_s5, 4  ;;  %s768_s20 = int_to_ptr.vmem [resolvable:$true] %s767_s20 }
  0xe1   :  { %680 = vmatmul.f32.vlgmr.msrb.gmra.mxu1 %v974_v47  ;;  %700 = vmatmul.f32.vlgmr.msrb.gmra.mxu2 %v977_v49 }
  0xe2   :  { %720 = vmatmul.f32.vlgmr.msrb.gmra.mxu3 %v980_v52 }
 0x117   :  { %v421_v56 = vpop.f32.mrf.mxu0 }
 0x118   :  { %v441_v57 = vpop.f32.mrf.mxu1  ;;  %v422_v45 = vadd.f32 %v421_v56, %v396_v2 }
 0x11a   :  { %v442_v52 = vadd.f32 %v441_v57, %v422_v45 }
 0x11f   :  { %v461_v58 = vpop.f32.mrf.mxu2 }
 0x120   :  { %v481_v60 = vpop.f32.mrf.mxu3  ;;  %v462_v11 = vadd.f32 %v461_v58, %v442_v52 }
 0x121   :  { %v501_v59 = vpop.f32.mrf.mxu0 }
 0x122   :  { %v521_v63 = vpop.f32.mrf.mxu1  ;;  %v502_v5 = vadd.f32 %v501_v59, %v397_v62  ;;  %v482_v17 = vadd.f32 %v481_v60, %v462_v11 }
 0x124   :  { %v522_v7 = vadd.f32 %v521_v63, %v502_v5  ;;  %v724_v25 = vmax.f32 %v482_v17, 0.0 }
 0x126   :  { %v738_v33 = vmul.f32 %v730_v23, %v724_v25 }
 0x128   :  { %v541_v0 = vpop.f32.mrf.mxu2 }
 0x129   :  { %v561_v47 = vpop.f32.mrf.mxu3  ;;  %v542_v9 = vadd.f32 %v541_v0, %v522_v7 }
 0x12b   :  { %v562_v14 = vadd.f32 %v561_v47, %v542_v9 }
 0x12d   :  { %v725_v21 = vmax.f32 %v562_v14, 0.0 }
 0x12f   :  { %v739_v30 = vmul.f32 %v731_v22, %v725_v21 }
 0x131   :  { %v742_v38 = vadd.f32 %v739_v30, %v738_v33 }
 0x13b   :  { %v581_v4 = vpop.f32.mrf.mxu0 }
 0x13c   :  { %v582_v6 = vadd.f32 %v581_v4, %v398_v3  ;;  %v601_v49 = vpop.f32.mrf.mxu1 }
 0x13e   :  { %v602_v10 = vadd.f32 %v601_v49, %v582_v6 }
 0x142   :  { %v621_v8 = vpop.f32.mrf.mxu2 }
 0x143   :  { %v622_v12 = vadd.f32 %v621_v8, %v602_v10  ;;  %v641_v16 = vpop.f32.mrf.mxu3 }
 0x145   :  { %v642_v19 = vadd.f32 %v641_v16, %v622_v12 }
 0x147   :  { %v726_v26 = vmax.f32 %v642_v19, 0.0 }
 0x149   :  { %v740_v34 = vmul.f32 %v732_v27, %v726_v26 }
 0x14b   :  { %v743_v40 = vadd.f32 %v742_v38, %v740_v34 }
 0x15d   :  { %v661_v15 = vpop.f32.mrf.mxu0 }
 0x15e   :  { %v662_v20 = vadd.f32 %v661_v15, %v399_v13  ;;  %v681_v24 = vpop.f32.mrf.mxu1 }
 0x160   :  { %v682_v28 = vadd.f32 %v681_v24, %v662_v20 }
 0x164   :  { %v701_v29 = vpop.f32.mrf.mxu2 }
 0x165   :  { %v702_v31 = vadd.f32 %v701_v29, %v682_v28  ;;  %v721_v32 = vpop.f32.mrf.mxu3 }
 0x167   :  { %v722_v35 = vadd.f32 %v721_v32, %v702_v31 }
 0x169   :  { %v727_v37 = vmax.f32 %v722_v35, 0.0 }
 0x16b   :  { %v741_v39 = vmul.f32 %v733_v36, %v727_v37 }
 0x16d   :  { %v744_v1 = vadd.f32 %v743_v40, %v741_v39 }
 0x16f   :  { %745 = vadd.xlane.f32.xlu1 %v744_v1 }
 0x1e2   :  { %v746_v42 = vpop.xlane.xlu1 %745 }
 0x1e3   :  { %v751_v43 = vadd.f32 %v792_v41, %v746_v42 }
 0x1e5   :  { %754 = vperm.xlu1 %790, %v751_v43  }
 0x257   :  { %v755_v48 = vpop.permute.xlu1 %754 }
 0x258   :  { %v758_v50 = vperm.slane %v755_v48, %v757_v46 }
 0x25a   :  { %761 = vst.msk [vmem:[#allocation9] sm:$0x1] %vm760_vm0, %v758_v50 }
 0x25b   :  { %772 = dma.vmem_to_hbm [thread:$0]  %s768_s20, 16, %s770_s23, [#allocation5]  }
 0x25c   :  { %901 = dma.done.wait [#allocation5], 16  }
 0x25d   :  { %902 = vsyncadd [#allocation5], 4294967280 }
 0x25e   :  { %777 = vsyncpa [#allocation4], 1 }
 0x25f   :  { %778 = vsyncpa [#allocation7], 1 }
 0x260   :  { %779 = vsyncpa [#allocation5], 1 }

</bundles_post_ra>
